<compile_context>
chip_gen: v6e
topology: v6e:2x2x1
jax: 0.10.0
libtpu: 0.0.40
codegen_flags: <defaults>
</compile_context>

<pallas_src>
import functools

import jax
import jax.numpy as jnp
from jax.experimental import pallas as pl
from jax.experimental.pallas import tpu as pltpu


def _block_kernel(x_ref, w_ref, b_ref, o_ref, *,
                  N, C_in, L, K, pad, L_slab, L_out, topk):
    """Whole batch: wide conv1d (one im2col MXU contraction, im2col built in
    registers) + k-max pool + fused bias + tanh, lane-dense output."""
    C_out = w_ref.shape[0]
    f32 = jnp.float32

    # ---- im2col in registers (no VMEM scratch, no masked stores) -----------
    # rhs[t*C_in + ci, n*L_slab + j] = x_pad[n, ci, j + t]
    #   (x_pad = x zero-padded by `pad` on both sides; slab width L_slab=128*m)
    blocks = []
    for n in range(N):                       # N, K tiny & static -> unrolled
        xn = x_ref[n]                        # (C_in, L), loaded exactly once
        taps = []
        for t in range(K):
            lead = pad - t                   # pad = 2*(K//2) >= K-1  =>  >= 0
            trail = L_slab - L - lead        # > 0 for these sizes
            parts = []
            if lead:
                parts.append(jnp.zeros((C_in, lead), f32))
            parts.append(xn)
            if trail:
                parts.append(jnp.zeros((C_in, trail), f32))
            tap = parts[0] if len(parts) == 1 else jnp.concatenate(parts, axis=-1)
            taps.append(tap)                 # (C_in, L_slab)
        blocks.append(jnp.concatenate(taps, axis=0))        # (K*C_in, L_slab)
    rhs = blocks[0] if N == 1 else jnp.concatenate(blocks, axis=-1)
    # rhs: (K*C_in, N*L_slab), batch slabs on 128-lane-tile boundaries.

    # ---- single MXU contraction --------------------------------------------
    #   acc[c, n*L_slab + j] = sum_{ci,t} w[c,ci,t] * x_pad[n, ci, j + t]
    acc = jnp.dot(w_ref[...], rhs,
                  preferred_element_type=jnp.float32)       # (C_out, N*L_slab)

    # ---- dynamic k-max pooling + fused (conv+block) bias + tanh ------------
    b = b_ref[...]                                           # (C_out, 1)
    idx = jax.lax.broadcasted_iota(jnp.int32, (C_out, L_slab), 1)
    neg_inf = f32(-jnp.inf)
    pad_cols = o_ref.shape[-1] - topk

    for n in range(N):
        # Static lane-tile-aligned 2D slice: free view, no relayout.
        slab = acc[:, n * L_slab:(n + 1) * L_slab]           # (C_out, L_slab)
        # Only the first L_out positions of each slab are real conv outputs.
        cur = jnp.where(idx < L_out, slab, neg_inf)
        vals = []
        for i in range(topk):                # topk small & static -> unrolled
            m = jnp.max(cur, axis=-1, keepdims=True)         # (C_out, 1)
            vals.append(m)
            if i + 1 < topk:
                # first occurrence of the max (matches torch.topk semantics)
                first = jnp.min(jnp.where(cur == m, idx, L_slab),
                                axis=-1, keepdims=True)
                cur = jnp.where(idx == first, neg_inf, cur)
        row = jnp.tanh(jnp.concatenate(vals, axis=-1) + b)   # (C_out, topk)
        if pad_cols:
            row = jnp.concatenate(
                [row, jnp.zeros((C_out, pad_cols), f32)], axis=-1)
        o_ref[n] = row                       # one lane-dense unmasked store


def dcnn_block(x, w, conv_b, blk_b, *, kernel_size, topk, seq_len,
               conv_layer_idx, conv_layer_total):
    """Forward pass of `Block`.

    x:      (N, C_in, L)     float32
    w:      (C_out, C_in, K) conv weight
    conv_b: (C_out,)         conv bias
    blk_b:  (1, C_out, 1)    block bias parameter
    returns (N, C_out, k)
    """
    N, C_in, L = x.shape
    C_out, _, K = w.shape
    assert K == kernel_size

    # DynamicKmaxPool1d: k = max(topk, int((1 - idx/total) * seq_len))
    k = max(topk, int((1.0 - conv_layer_idx / conv_layer_total) * seq_len))

    pad = 2 * (K // 2)                      # "wide" convolution padding
    L_pad = L + 2 * pad
    L_out = L_pad - K + 1                   # = L + K - 1 for odd K
    assert k <= L_out, "k-max pooling needs k <= conv output length"
    # Per-batch slab width / output width, rounded up to full lane tiles.
    L_slab = ((L_pad + 127) // 128) * 128
    out_lanes = ((k + 127) // 128) * 128

    # Tiny wrapper-side parameter reshapes (weights/bias only; x stays raw).
    # w_flat[c, t*C_in + ci] = w[c, ci, t]  -- matches the im2col row order.
    w_flat = jnp.transpose(w, (0, 2, 1)).reshape(C_out, K * C_in)
    w_flat = w_flat.astype(jnp.float32)
    # Fuse conv bias into block bias (exact: per-channel constant commutes
    # with top-k).
    b_fused = (conv_b.reshape(C_out, 1) + blk_b.reshape(C_out, 1))
    b_fused = b_fused.astype(jnp.float32)

    kern = functools.partial(
        _block_kernel, N=N, C_in=C_in, L=L, K=K, pad=pad,
        L_slab=L_slab, L_out=L_out, topk=k)

    out = pl.pallas_call(
        kern,
        out_shape=jax.ShapeDtypeStruct((N, C_out, out_lanes), jnp.float32),
        grid=(1,),                                   # single invocation
        in_specs=[
            pl.BlockSpec((N, C_in, L), lambda i: (0, 0, 0)),        # x (raw)
            pl.BlockSpec((C_out, K * C_in), lambda i: (0, 0)),      # w_flat
            pl.BlockSpec((C_out, 1), lambda i: (0, 0)),             # fused bias
        ],
        out_specs=pl.BlockSpec((N, C_out, out_lanes), lambda i: (0, 0, 0)),
        compiler_params=pltpu.CompilerParams(
            dimension_semantics=("arbitrary",)),
    )(x.astype(jnp.float32), w_flat, b_fused)

    # Kernel emits lane-dense (N, C_out, out_lanes); take the first k lanes.
    return out[:, :, :k]


def _reference(x, w, conv_b, blk_b, *, kernel_size, k):
    """Pure-JAX reference mirroring the PyTorch forward."""
    pad = 2 * (kernel_size // 2)
    y = jax.lax.conv_general_dilated(
        x, w, window_strides=(1,), padding=[(pad, pad)],
        dimension_numbers=("NCH", "OIH", "NCH"))
    y = y + conv_b[None, :, None]
    topv = jax.lax.top_k(y, k)[0]                      # descending values
    return jnp.tanh(topv + blk_b.reshape(1, -1, 1))


if __name__ == "__main__":
    # Module hyper-parameters (small, consistent with the torch module).
    N, C_in, C_out = 2, 4, 6
    L = seq_len = 16
    K = 3
    topk = 4
    conv_layer_idx, conv_layer_total = 1, 3            # -> k = max(4, 10) = 10

    key = jax.random.PRNGKey(0)
    kx, kw, kb, kbb = jax.random.split(key, 4)
    x = jax.random.normal(kx, (N, C_in, L), jnp.float32)
    w = jax.random.normal(kw, (C_out, C_in, K), jnp.float32) * 0.2
    conv_b = jax.random.normal(kb, (C_out,), jnp.float32) * 0.1
    # nn.Parameter(torch.zeros((1, C_out, 1))) -- use deterministic nonzero
    # values so the bias add is actually exercised.
    blk_b = jax.random.normal(kbb, (1, C_out, 1), jnp.float32) * 0.1

    out = dcnn_block(x, w, conv_b, blk_b,
                     kernel_size=K, topk=topk, seq_len=seq_len,
                     conv_layer_idx=conv_layer_idx,
                     conv_layer_total=conv_layer_total)
    out = jax.block_until_ready(out)

    k = max(topk, int((1.0 - conv_layer_idx / conv_layer_total) * seq_len))
    ref = _reference(x, w, conv_b, blk_b, kernel_size=K, k=k)
    assert out.shape == (N, C_out, k), out.shape
    assert jnp.allclose(out, ref, atol=1e-5, rtol=1e-5), float(
        jnp.max(jnp.abs(out - ref)))

    print("KERNEL_OK")
</pallas_src>

<mosaic_0001>
module attributes {stable_mosaic.version = 11 : i64} {
  func.func @_block_kernel(%arg0: i32, %arg1: memref<2x4x16xf32, #tpu.memory_space<vmem>>, %arg2: memref<6x12xf32, #tpu.memory_space<vmem>>, %arg3: memref<6x1xf32, #tpu.memory_space<vmem>>, %arg4: memref<2x6x128xf32, #tpu.memory_space<vmem>>) attributes {dimension_semantics = [#tpu.dimension_semantics<arbitrary>], iteration_bounds = array<i64: 1>, scalar_prefetch = 0 : i64, scratch_operands = 0 : i64, tpu.core_type = #tpu.core_type<tc>, window_params = [{pipeline_mode = #tpu.pipeline_mode<synchronous>, transform_indices = @transform_0, window_bounds = array<i64: 2, 4, 16>}, {pipeline_mode = #tpu.pipeline_mode<synchronous>, transform_indices = @transform_1, window_bounds = array<i64: 6, 12>}, {pipeline_mode = #tpu.pipeline_mode<synchronous>, transform_indices = @transform_2, window_bounds = array<i64: 6, 1>}, {pipeline_mode = #tpu.pipeline_mode<synchronous>, transform_indices = @transform_3, window_bounds = array<i64: 2, 6, 128>}]} {
    %c0 = arith.constant 0 : index
    %c0_0 = arith.constant 0 : index
    %c0_1 = arith.constant 0 : index
    %0 = vector.load %arg1[%c0, %c0_0, %c0_1] : memref<2x4x16xf32, #tpu.memory_space<vmem>>, vector<1x4x16xf32>
    %1 = vector.shape_cast %0 : vector<1x4x16xf32> to vector<4x16xf32>
    %cst = arith.constant 0.000000e+00 : f32
    %2 = vector.broadcast %cst : f32 to vector<4x2xf32>
    %cst_2 = arith.constant 0.000000e+00 : f32
    %3 = vector.broadcast %cst_2 : f32 to vector<4x110xf32>
    %4 = tpu.concatenate %2, %1, %3 in 1 : vector<4x2xf32>, vector<4x16xf32>, vector<4x110xf32> -> vector<4x128xf32>
    %cst_3 = arith.constant 0.000000e+00 : f32
    %5 = vector.broadcast %cst_3 : f32 to vector<4x1xf32>
    %cst_4 = arith.constant 0.000000e+00 : f32
    %6 = vector.broadcast %cst_4 : f32 to vector<4x111xf32>
    %7 = tpu.concatenate %5, %1, %6 in 1 : vector<4x1xf32>, vector<4x16xf32>, vector<4x111xf32> -> vector<4x128xf32>
    %cst_5 = arith.constant 0.000000e+00 : f32
    %8 = vector.broadcast %cst_5 : f32 to vector<4x112xf32>
    %9 = tpu.concatenate %1, %8 in 1 : vector<4x16xf32>, vector<4x112xf32> -> vector<4x128xf32>
    %10 = tpu.concatenate %4, %7, %9 in 0 : vector<4x128xf32>, vector<4x128xf32>, vector<4x128xf32> -> vector<12x128xf32>
    %c1 = arith.constant 1 : index
    %c0_6 = arith.constant 0 : index
    %c0_7 = arith.constant 0 : index
    %11 = vector.load %arg1[%c1, %c0_6, %c0_7] : memref<2x4x16xf32, #tpu.memory_space<vmem>>, vector<1x4x16xf32>
    %12 = vector.shape_cast %11 : vector<1x4x16xf32> to vector<4x16xf32>
    %cst_8 = arith.constant 0.000000e+00 : f32
    %13 = vector.broadcast %cst_8 : f32 to vector<4x2xf32>
    %cst_9 = arith.constant 0.000000e+00 : f32
    %14 = vector.broadcast %cst_9 : f32 to vector<4x110xf32>
    %15 = tpu.concatenate %13, %12, %14 in 1 : vector<4x2xf32>, vector<4x16xf32>, vector<4x110xf32> -> vector<4x128xf32>
    %cst_10 = arith.constant 0.000000e+00 : f32
    %16 = vector.broadcast %cst_10 : f32 to vector<4x1xf32>
    %cst_11 = arith.constant 0.000000e+00 : f32
    %17 = vector.broadcast %cst_11 : f32 to vector<4x111xf32>
    %18 = tpu.concatenate %16, %12, %17 in 1 : vector<4x1xf32>, vector<4x16xf32>, vector<4x111xf32> -> vector<4x128xf32>
    %cst_12 = arith.constant 0.000000e+00 : f32
    %19 = vector.broadcast %cst_12 : f32 to vector<4x112xf32>
    %20 = tpu.concatenate %12, %19 in 1 : vector<4x16xf32>, vector<4x112xf32> -> vector<4x128xf32>
    %21 = tpu.concatenate %15, %18, %20 in 0 : vector<4x128xf32>, vector<4x128xf32>, vector<4x128xf32> -> vector<12x128xf32>
    %22 = tpu.concatenate %10, %21 in 1 : vector<12x128xf32>, vector<12x128xf32> -> vector<12x256xf32>
    %c0_13 = arith.constant 0 : index
    %c0_14 = arith.constant 0 : index
    %23 = vector.load %arg2[%c0_13, %c0_14] : memref<6x12xf32, #tpu.memory_space<vmem>>, vector<6x12xf32>
    %cst_15 = arith.constant dense<0.000000e+00> : vector<6x256xf32>
    %24 = tpu.matmul %23, %22, %cst_15 {dimension_numbers = #tpu.dot_dimension_numbers<[1], [0], [0], [1], [0, 0, 1, 1], [], []>} : vector<6x12xf32>, vector<12x256xf32>, vector<6x256xf32> -> vector<6x256xf32>
    %c0_16 = arith.constant 0 : index
    %c0_17 = arith.constant 0 : index
    %25 = vector.load %arg3[%c0_16, %c0_17] : memref<6x1xf32, #tpu.memory_space<vmem>>, vector<6x1xf32>
    %26 = tpu.iota {dimensions = array<i32: 1>} : vector<6x128xi32>
    %27 = vector.extract_strided_slice %24 {offsets = [0, 0], sizes = [6, 128], strides = [1, 1]} : vector<6x256xf32> to vector<6x128xf32>
    %c18_i32 = arith.constant 18 : i32
    %28 = vector.broadcast %c18_i32 : i32 to vector<6x128xi32>
    %29 = arith.cmpi slt, %26, %28 : vector<6x128xi32>
    %cst_18 = arith.constant 0xFF800000 : f32
    %30 = vector.broadcast %cst_18 : f32 to vector<6x128xf32>
    %31 = arith.select %29, %27, %30 : vector<6x128xi1>, vector<6x128xf32>
    %cst_19 = arith.constant dense<0xFF800000> : vector<6xf32>
    %32 = vector.multi_reduction <maximumf>, %31, %cst_19 [1] : vector<6x128xf32> to vector<6xf32>
    %33 = vector.shape_cast %32 : vector<6xf32> to vector<6x1xf32>
    %34 = vector.broadcast %33 : vector<6x1xf32> to vector<6x128xf32>
    %35 = arith.cmpf oeq, %31, %34 : vector<6x128xf32>
    %c128_i32 = arith.constant 128 : i32
    %36 = vector.broadcast %c128_i32 : i32 to vector<6x128xi32>
    %37 = arith.select %35, %26, %36 : vector<6x128xi1>, vector<6x128xi32>
    %cst_20 = arith.constant dense<2147483647> : vector<6xi32>
    %38 = vector.multi_reduction <minsi>, %37, %cst_20 [1] : vector<6x128xi32> to vector<6xi32>
    %39 = vector.shape_cast %38 : vector<6xi32> to vector<6x1xi32>
    %40 = vector.broadcast %39 : vector<6x1xi32> to vector<6x128xi32>
    %41 = arith.cmpi eq, %26, %40 : vector<6x128xi32>
    %cst_21 = arith.constant 0xFF800000 : f32
    %42 = vector.broadcast %cst_21 : f32 to vector<6x128xf32>
    %43 = arith.select %41, %42, %31 : vector<6x128xi1>, vector<6x128xf32>
    %cst_22 = arith.constant dense<0xFF800000> : vector<6xf32>
    %44 = vector.multi_reduction <maximumf>, %43, %cst_22 [1] : vector<6x128xf32> to vector<6xf32>
    %45 = vector.shape_cast %44 : vector<6xf32> to vector<6x1xf32>
    %46 = vector.broadcast %45 : vector<6x1xf32> to vector<6x128xf32>
    %47 = arith.cmpf oeq, %43, %46 : vector<6x128xf32>
    %c128_i32_23 = arith.constant 128 : i32
    %48 = vector.broadcast %c128_i32_23 : i32 to vector<6x128xi32>
    %49 = arith.select %47, %26, %48 : vector<6x128xi1>, vector<6x128xi32>
    %cst_24 = arith.constant dense<2147483647> : vector<6xi32>
    %50 = vector.multi_reduction <minsi>, %49, %cst_24 [1] : vector<6x128xi32> to vector<6xi32>
    %51 = vector.shape_cast %50 : vector<6xi32> to vector<6x1xi32>
    %52 = vector.broadcast %51 : vector<6x1xi32> to vector<6x128xi32>
    %53 = arith.cmpi eq, %26, %52 : vector<6x128xi32>
    %cst_25 = arith.constant 0xFF800000 : f32
    %54 = vector.broadcast %cst_25 : f32 to vector<6x128xf32>
    %55 = arith.select %53, %54, %43 : vector<6x128xi1>, vector<6x128xf32>
    %cst_26 = arith.constant dense<0xFF800000> : vector<6xf32>
    %56 = vector.multi_reduction <maximumf>, %55, %cst_26 [1] : vector<6x128xf32> to vector<6xf32>
    %57 = vector.shape_cast %56 : vector<6xf32> to vector<6x1xf32>
    %58 = vector.broadcast %57 : vector<6x1xf32> to vector<6x128xf32>
    %59 = arith.cmpf oeq, %55, %58 : vector<6x128xf32>
    %c128_i32_27 = arith.constant 128 : i32
    %60 = vector.broadcast %c128_i32_27 : i32 to vector<6x128xi32>
    %61 = arith.select %59, %26, %60 : vector<6x128xi1>, vector<6x128xi32>
    %cst_28 = arith.constant dense<2147483647> : vector<6xi32>
    %62 = vector.multi_reduction <minsi>, %61, %cst_28 [1] : vector<6x128xi32> to vector<6xi32>
    %63 = vector.shape_cast %62 : vector<6xi32> to vector<6x1xi32>
    %64 = vector.broadcast %63 : vector<6x1xi32> to vector<6x128xi32>
    %65 = arith.cmpi eq, %26, %64 : vector<6x128xi32>
    %cst_29 = arith.constant 0xFF800000 : f32
    %66 = vector.broadcast %cst_29 : f32 to vector<6x128xf32>
    %67 = arith.select %65, %66, %55 : vector<6x128xi1>, vector<6x128xf32>
    %cst_30 = arith.constant dense<0xFF800000> : vector<6xf32>
    %68 = vector.multi_reduction <maximumf>, %67, %cst_30 [1] : vector<6x128xf32> to vector<6xf32>
    %69 = vector.shape_cast %68 : vector<6xf32> to vector<6x1xf32>
    %70 = vector.broadcast %69 : vector<6x1xf32> to vector<6x128xf32>
    %71 = arith.cmpf oeq, %67, %70 : vector<6x128xf32>
    %c128_i32_31 = arith.constant 128 : i32
    %72 = vector.broadcast %c128_i32_31 : i32 to vector<6x128xi32>
    %73 = arith.select %71, %26, %72 : vector<6x128xi1>, vector<6x128xi32>
    %cst_32 = arith.constant dense<2147483647> : vector<6xi32>
    %74 = vector.multi_reduction <minsi>, %73, %cst_32 [1] : vector<6x128xi32> to vector<6xi32>
    %75 = vector.shape_cast %74 : vector<6xi32> to vector<6x1xi32>
    %76 = vector.broadcast %75 : vector<6x1xi32> to vector<6x128xi32>
    %77 = arith.cmpi eq, %26, %76 : vector<6x128xi32>
    %cst_33 = arith.constant 0xFF800000 : f32
    %78 = vector.broadcast %cst_33 : f32 to vector<6x128xf32>
    %79 = arith.select %77, %78, %67 : vector<6x128xi1>, vector<6x128xf32>
    %cst_34 = arith.constant dense<0xFF800000> : vector<6xf32>
    %80 = vector.multi_reduction <maximumf>, %79, %cst_34 [1] : vector<6x128xf32> to vector<6xf32>
    %81 = vector.shape_cast %80 : vector<6xf32> to vector<6x1xf32>
    %82 = vector.broadcast %81 : vector<6x1xf32> to vector<6x128xf32>
    %83 = arith.cmpf oeq, %79, %82 : vector<6x128xf32>
    %c128_i32_35 = arith.constant 128 : i32
    %84 = vector.broadcast %c128_i32_35 : i32 to vector<6x128xi32>
    %85 = arith.select %83, %26, %84 : vector<6x128xi1>, vector<6x128xi32>
    %cst_36 = arith.constant dense<2147483647> : vector<6xi32>
    %86 = vector.multi_reduction <minsi>, %85, %cst_36 [1] : vector<6x128xi32> to vector<6xi32>
    %87 = vector.shape_cast %86 : vector<6xi32> to vector<6x1xi32>
    %88 = vector.broadcast %87 : vector<6x1xi32> to vector<6x128xi32>
    %89 = arith.cmpi eq, %26, %88 : vector<6x128xi32>
    %cst_37 = arith.constant 0xFF800000 : f32
    %90 = vector.broadcast %cst_37 : f32 to vector<6x128xf32>
    %91 = arith.select %89, %90, %79 : vector<6x128xi1>, vector<6x128xf32>
    %cst_38 = arith.constant dense<0xFF800000> : vector<6xf32>
    %92 = vector.multi_reduction <maximumf>, %91, %cst_38 [1] : vector<6x128xf32> to vector<6xf32>
    %93 = vector.shape_cast %92 : vector<6xf32> to vector<6x1xf32>
    %94 = vector.broadcast %93 : vector<6x1xf32> to vector<6x128xf32>
    %95 = arith.cmpf oeq, %91, %94 : vector<6x128xf32>
    %c128_i32_39 = arith.constant 128 : i32
    %96 = vector.broadcast %c128_i32_39 : i32 to vector<6x128xi32>
    %97 = arith.select %95, %26, %96 : vector<6x128xi1>, vector<6x128xi32>
    %cst_40 = arith.constant dense<2147483647> : vector<6xi32>
    %98 = vector.multi_reduction <minsi>, %97, %cst_40 [1] : vector<6x128xi32> to vector<6xi32>
    %99 = vector.shape_cast %98 : vector<6xi32> to vector<6x1xi32>
    %100 = vector.broadcast %99 : vector<6x1xi32> to vector<6x128xi32>
    %101 = arith.cmpi eq, %26, %100 : vector<6x128xi32>
    %cst_41 = arith.constant 0xFF800000 : f32
    %102 = vector.broadcast %cst_41 : f32 to vector<6x128xf32>
    %103 = arith.select %101, %102, %91 : vector<6x128xi1>, vector<6x128xf32>
    %cst_42 = arith.constant dense<0xFF800000> : vector<6xf32>
    %104 = vector.multi_reduction <maximumf>, %103, %cst_42 [1] : vector<6x128xf32> to vector<6xf32>
    %105 = vector.shape_cast %104 : vector<6xf32> to vector<6x1xf32>
    %106 = vector.broadcast %105 : vector<6x1xf32> to vector<6x128xf32>
    %107 = arith.cmpf oeq, %103, %106 : vector<6x128xf32>
    %c128_i32_43 = arith.constant 128 : i32
    %108 = vector.broadcast %c128_i32_43 : i32 to vector<6x128xi32>
    %109 = arith.select %107, %26, %108 : vector<6x128xi1>, vector<6x128xi32>
    %cst_44 = arith.constant dense<2147483647> : vector<6xi32>
    %110 = vector.multi_reduction <minsi>, %109, %cst_44 [1] : vector<6x128xi32> to vector<6xi32>
    %111 = vector.shape_cast %110 : vector<6xi32> to vector<6x1xi32>
    %112 = vector.broadcast %111 : vector<6x1xi32> to vector<6x128xi32>
    %113 = arith.cmpi eq, %26, %112 : vector<6x128xi32>
    %cst_45 = arith.constant 0xFF800000 : f32
    %114 = vector.broadcast %cst_45 : f32 to vector<6x128xf32>
    %115 = arith.select %113, %114, %103 : vector<6x128xi1>, vector<6x128xf32>
    %cst_46 = arith.constant dense<0xFF800000> : vector<6xf32>
    %116 = vector.multi_reduction <maximumf>, %115, %cst_46 [1] : vector<6x128xf32> to vector<6xf32>
    %117 = vector.shape_cast %116 : vector<6xf32> to vector<6x1xf32>
    %118 = vector.broadcast %117 : vector<6x1xf32> to vector<6x128xf32>
    %119 = arith.cmpf oeq, %115, %118 : vector<6x128xf32>
    %c128_i32_47 = arith.constant 128 : i32
    %120 = vector.broadcast %c128_i32_47 : i32 to vector<6x128xi32>
    %121 = arith.select %119, %26, %120 : vector<6x128xi1>, vector<6x128xi32>
    %cst_48 = arith.constant dense<2147483647> : vector<6xi32>
    %122 = vector.multi_reduction <minsi>, %121, %cst_48 [1] : vector<6x128xi32> to vector<6xi32>
    %123 = vector.shape_cast %122 : vector<6xi32> to vector<6x1xi32>
    %124 = vector.broadcast %123 : vector<6x1xi32> to vector<6x128xi32>
    %125 = arith.cmpi eq, %26, %124 : vector<6x128xi32>
    %cst_49 = arith.constant 0xFF800000 : f32
    %126 = vector.broadcast %cst_49 : f32 to vector<6x128xf32>
    %127 = arith.select %125, %126, %115 : vector<6x128xi1>, vector<6x128xf32>
    %cst_50 = arith.constant dense<0xFF800000> : vector<6xf32>
    %128 = vector.multi_reduction <maximumf>, %127, %cst_50 [1] : vector<6x128xf32> to vector<6xf32>
    %129 = vector.shape_cast %128 : vector<6xf32> to vector<6x1xf32>
    %130 = vector.broadcast %129 : vector<6x1xf32> to vector<6x128xf32>
    %131 = arith.cmpf oeq, %127, %130 : vector<6x128xf32>
    %c128_i32_51 = arith.constant 128 : i32
    %132 = vector.broadcast %c128_i32_51 : i32 to vector<6x128xi32>
    %133 = arith.select %131, %26, %132 : vector<6x128xi1>, vector<6x128xi32>
    %cst_52 = arith.constant dense<2147483647> : vector<6xi32>
    %134 = vector.multi_reduction <minsi>, %133, %cst_52 [1] : vector<6x128xi32> to vector<6xi32>
    %135 = vector.shape_cast %134 : vector<6xi32> to vector<6x1xi32>
    %136 = vector.broadcast %135 : vector<6x1xi32> to vector<6x128xi32>
    %137 = arith.cmpi eq, %26, %136 : vector<6x128xi32>
    %cst_53 = arith.constant 0xFF800000 : f32
    %138 = vector.broadcast %cst_53 : f32 to vector<6x128xf32>
    %139 = arith.select %137, %138, %127 : vector<6x128xi1>, vector<6x128xf32>
    %cst_54 = arith.constant dense<0xFF800000> : vector<6xf32>
    %140 = vector.multi_reduction <maximumf>, %139, %cst_54 [1] : vector<6x128xf32> to vector<6xf32>
    %141 = vector.shape_cast %140 : vector<6xf32> to vector<6x1xf32>
    %142 = tpu.concatenate %33, %45, %57, %69, %81, %93, %105, %117, %129, %141 in 1 : vector<6x1xf32>, vector<6x1xf32>, vector<6x1xf32>, vector<6x1xf32>, vector<6x1xf32>, vector<6x1xf32>, vector<6x1xf32>, vector<6x1xf32>, vector<6x1xf32>, vector<6x1xf32> -> vector<6x10xf32>
    %143 = vector.broadcast %25 : vector<6x1xf32> to vector<6x10xf32>
    %144 = arith.addf %142, %143 : vector<6x10xf32>
    %145 = math.tanh %144 : vector<6x10xf32>
    %cst_55 = arith.constant 0.000000e+00 : f32
    %146 = vector.broadcast %cst_55 : f32 to vector<6x118xf32>
    %147 = tpu.concatenate %145, %146 in 1 : vector<6x10xf32>, vector<6x118xf32> -> vector<6x128xf32>
    %c0_56 = arith.constant 0 : index
    %c0_57 = arith.constant 0 : index
    %c0_58 = arith.constant 0 : index
    %148 = vector.load %arg4[%c0_56, %c0_57, %c0_58] : memref<2x6x128xf32, #tpu.memory_space<vmem>>, vector<1x6x128xf32>
    %149 = vector.shape_cast %148 : vector<1x6x128xf32> to vector<6x128xf32>
    %150 = vector.shape_cast %147 : vector<6x128xf32> to vector<1x6x128xf32>
    tpu.vector_store %arg4[%c0_56, %c0_57, %c0_58], %150 {strides = array<i32>} : memref<2x6x128xf32, #tpu.memory_space<vmem>>, vector<1x6x128xf32>,
    %151 = vector.extract_strided_slice %24 {offsets = [0, 128], sizes = [6, 128], strides = [1, 1]} : vector<6x256xf32> to vector<6x128xf32>
    %c18_i32_59 = arith.constant 18 : i32
    %152 = vector.broadcast %c18_i32_59 : i32 to vector<6x128xi32>
    %153 = arith.cmpi slt, %26, %152 : vector<6x128xi32>
    %cst_60 = arith.constant 0xFF800000 : f32
    %154 = vector.broadcast %cst_60 : f32 to vector<6x128xf32>
    %155 = arith.select %153, %151, %154 : vector<6x128xi1>, vector<6x128xf32>
    %cst_61 = arith.constant dense<0xFF800000> : vector<6xf32>
    %156 = vector.multi_reduction <maximumf>, %155, %cst_61 [1] : vector<6x128xf32> to vector<6xf32>
    %157 = vector.shape_cast %156 : vector<6xf32> to vector<6x1xf32>
    %158 = vector.broadcast %157 : vector<6x1xf32> to vector<6x128xf32>
    %159 = arith.cmpf oeq, %155, %158 : vector<6x128xf32>
    %c128_i32_62 = arith.constant 128 : i32
    %160 = vector.broadcast %c128_i32_62 : i32 to vector<6x128xi32>
    %161 = arith.select %159, %26, %160 : vector<6x128xi1>, vector<6x128xi32>
    %cst_63 = arith.constant dense<2147483647> : vector<6xi32>
    %162 = vector.multi_reduction <minsi>, %161, %cst_63 [1] : vector<6x128xi32> to vector<6xi32>
    %163 = vector.shape_cast %162 : vector<6xi32> to vector<6x1xi32>
    %164 = vector.broadcast %163 : vector<6x1xi32> to vector<6x128xi32>
    %165 = arith.cmpi eq, %26, %164 : vector<6x128xi32>
    %cst_64 = arith.constant 0xFF800000 : f32
    %166 = vector.broadcast %cst_64 : f32 to vector<6x128xf32>
    %167 = arith.select %165, %166, %155 : vector<6x128xi1>, vector<6x128xf32>
    %cst_65 = arith.constant dense<0xFF800000> : vector<6xf32>
    %168 = vector.multi_reduction <maximumf>, %167, %cst_65 [1] : vector<6x128xf32> to vector<6xf32>
    %169 = vector.shape_cast %168 : vector<6xf32> to vector<6x1xf32>
    %170 = vector.broadcast %169 : vector<6x1xf32> to vector<6x128xf32>
    %171 = arith.cmpf oeq, %167, %170 : vector<6x128xf32>
    %c128_i32_66 = arith.constant 128 : i32
    %172 = vector.broadcast %c128_i32_66 : i32 to vector<6x128xi32>
    %173 = arith.select %171, %26, %172 : vector<6x128xi1>, vector<6x128xi32>
    %cst_67 = arith.constant dense<2147483647> : vector<6xi32>
    %174 = vector.multi_reduction <minsi>, %173, %cst_67 [1] : vector<6x128xi32> to vector<6xi32>
    %175 = vector.shape_cast %174 : vector<6xi32> to vector<6x1xi32>
    %176 = vector.broadcast %175 : vector<6x1xi32> to vector<6x128xi32>
    %177 = arith.cmpi eq, %26, %176 : vector<6x128xi32>
    %cst_68 = arith.constant 0xFF800000 : f32
    %178 = vector.broadcast %cst_68 : f32 to vector<6x128xf32>
    %179 = arith.select %177, %178, %167 : vector<6x128xi1>, vector<6x128xf32>
    %cst_69 = arith.constant dense<0xFF800000> : vector<6xf32>
    %180 = vector.multi_reduction <maximumf>, %179, %cst_69 [1] : vector<6x128xf32> to vector<6xf32>
    %181 = vector.shape_cast %180 : vector<6xf32> to vector<6x1xf32>
    %182 = vector.broadcast %181 : vector<6x1xf32> to vector<6x128xf32>
    %183 = arith.cmpf oeq, %179, %182 : vector<6x128xf32>
    %c128_i32_70 = arith.constant 128 : i32
    %184 = vector.broadcast %c128_i32_70 : i32 to vector<6x128xi32>
    %185 = arith.select %183, %26, %184 : vector<6x128xi1>, vector<6x128xi32>
    %cst_71 = arith.constant dense<2147483647> : vector<6xi32>
    %186 = vector.multi_reduction <minsi>, %185, %cst_71 [1] : vector<6x128xi32> to vector<6xi32>
    %187 = vector.shape_cast %186 : vector<6xi32> to vector<6x1xi32>
    %188 = vector.broadcast %187 : vector<6x1xi32> to vector<6x128xi32>
    %189 = arith.cmpi eq, %26, %188 : vector<6x128xi32>
    %cst_72 = arith.constant 0xFF800000 : f32
    %190 = vector.broadcast %cst_72 : f32 to vector<6x128xf32>
    %191 = arith.select %189, %190, %179 : vector<6x128xi1>, vector<6x128xf32>
    %cst_73 = arith.constant dense<0xFF800000> : vector<6xf32>
    %192 = vector.multi_reduction <maximumf>, %191, %cst_73 [1] : vector<6x128xf32> to vector<6xf32>
    %193 = vector.shape_cast %192 : vector<6xf32> to vector<6x1xf32>
    %194 = vector.broadcast %193 : vector<6x1xf32> to vector<6x128xf32>
    %195 = arith.cmpf oeq, %191, %194 : vector<6x128xf32>
    %c128_i32_74 = arith.constant 128 : i32
    %196 = vector.broadcast %c128_i32_74 : i32 to vector<6x128xi32>
    %197 = arith.select %195, %26, %196 : vector<6x128xi1>, vector<6x128xi32>
    %cst_75 = arith.constant dense<2147483647> : vector<6xi32>
    %198 = vector.multi_reduction <minsi>, %197, %cst_75 [1] : vector<6x128xi32> to vector<6xi32>
    %199 = vector.shape_cast %198 : vector<6xi32> to vector<6x1xi32>
    %200 = vector.broadcast %199 : vector<6x1xi32> to vector<6x128xi32>
    %201 = arith.cmpi eq, %26, %200 : vector<6x128xi32>
    %cst_76 = arith.constant 0xFF800000 : f32
    %202 = vector.broadcast %cst_76 : f32 to vector<6x128xf32>
    %203 = arith.select %201, %202, %191 : vector<6x128xi1>, vector<6x128xf32>
    %cst_77 = arith.constant dense<0xFF800000> : vector<6xf32>
    %204 = vector.multi_reduction <maximumf>, %203, %cst_77 [1] : vector<6x128xf32> to vector<6xf32>
    %205 = vector.shape_cast %204 : vector<6xf32> to vector<6x1xf32>
    %206 = vector.broadcast %205 : vector<6x1xf32> to vector<6x128xf32>
    %207 = arith.cmpf oeq, %203, %206 : vector<6x128xf32>
    %c128_i32_78 = arith.constant 128 : i32
    %208 = vector.broadcast %c128_i32_78 : i32 to vector<6x128xi32>
    %209 = arith.select %207, %26, %208 : vector<6x128xi1>, vector<6x128xi32>
    %cst_79 = arith.constant dense<2147483647> : vector<6xi32>
    %210 = vector.multi_reduction <minsi>, %209, %cst_79 [1] : vector<6x128xi32> to vector<6xi32>
    %211 = vector.shape_cast %210 : vector<6xi32> to vector<6x1xi32>
    %212 = vector.broadcast %211 : vector<6x1xi32> to vector<6x128xi32>
    %213 = arith.cmpi eq, %26, %212 : vector<6x128xi32>
    %cst_80 = arith.constant 0xFF800000 : f32
    %214 = vector.broadcast %cst_80 : f32 to vector<6x128xf32>
    %215 = arith.select %213, %214, %203 : vector<6x128xi1>, vector<6x128xf32>
    %cst_81 = arith.constant dense<0xFF800000> : vector<6xf32>
    %216 = vector.multi_reduction <maximumf>, %215, %cst_81 [1] : vector<6x128xf32> to vector<6xf32>
    %217 = vector.shape_cast %216 : vector<6xf32> to vector<6x1xf32>
    %218 = vector.broadcast %217 : vector<6x1xf32> to vector<6x128xf32>
    %219 = arith.cmpf oeq, %215, %218 : vector<6x128xf32>
    %c128_i32_82 = arith.constant 128 : i32
    %220 = vector.broadcast %c128_i32_82 : i32 to vector<6x128xi32>
    %221 = arith.select %219, %26, %220 : vector<6x128xi1>, vector<6x128xi32>
    %cst_83 = arith.constant dense<2147483647> : vector<6xi32>
    %222 = vector.multi_reduction <minsi>, %221, %cst_83 [1] : vector<6x128xi32> to vector<6xi32>
    %223 = vector.shape_cast %222 : vector<6xi32> to vector<6x1xi32>
    %224 = vector.broadcast %223 : vector<6x1xi32> to vector<6x128xi32>
    %225 = arith.cmpi eq, %26, %224 : vector<6x128xi32>
    %cst_84 = arith.constant 0xFF800000 : f32
    %226 = vector.broadcast %cst_84 : f32 to vector<6x128xf32>
    %227 = arith.select %225, %226, %215 : vector<6x128xi1>, vector<6x128xf32>
    %cst_85 = arith.constant dense<0xFF800000> : vector<6xf32>
    %228 = vector.multi_reduction <maximumf>, %227, %cst_85 [1] : vector<6x128xf32> to vector<6xf32>
    %229 = vector.shape_cast %228 : vector<6xf32> to vector<6x1xf32>
    %230 = vector.broadcast %229 : vector<6x1xf32> to vector<6x128xf32>
    %231 = arith.cmpf oeq, %227, %230 : vector<6x128xf32>
    %c128_i32_86 = arith.constant 128 : i32
    %232 = vector.broadcast %c128_i32_86 : i32 to vector<6x128xi32>
    %233 = arith.select %231, %26, %232 : vector<6x128xi1>, vector<6x128xi32>
    %cst_87 = arith.constant dense<2147483647> : vector<6xi32>
    %234 = vector.multi_reduction <minsi>, %233, %cst_87 [1] : vector<6x128xi32> to vector<6xi32>
    %235 = vector.shape_cast %234 : vector<6xi32> to vector<6x1xi32>
    %236 = vector.broadcast %235 : vector<6x1xi32> to vector<6x128xi32>
    %237 = arith.cmpi eq, %26, %236 : vector<6x128xi32>
    %cst_88 = arith.constant 0xFF800000 : f32
    %238 = vector.broadcast %cst_88 : f32 to vector<6x128xf32>
    %239 = arith.select %237, %238, %227 : vector<6x128xi1>, vector<6x128xf32>
    %cst_89 = arith.constant dense<0xFF800000> : vector<6xf32>
    %240 = vector.multi_reduction <maximumf>, %239, %cst_89 [1] : vector<6x128xf32> to vector<6xf32>
    %241 = vector.shape_cast %240 : vector<6xf32> to vector<6x1xf32>
    %242 = vector.broadcast %241 : vector<6x1xf32> to vector<6x128xf32>
    %243 = arith.cmpf oeq, %239, %242 : vector<6x128xf32>
    %c128_i32_90 = arith.constant 128 : i32
    %244 = vector.broadcast %c128_i32_90 : i32 to vector<6x128xi32>
    %245 = arith.select %243, %26, %244 : vector<6x128xi1>, vector<6x128xi32>
    %cst_91 = arith.constant dense<2147483647> : vector<6xi32>
    %246 = vector.multi_reduction <minsi>, %245, %cst_91 [1] : vector<6x128xi32> to vector<6xi32>
    %247 = vector.shape_cast %246 : vector<6xi32> to vector<6x1xi32>
    %248 = vector.broadcast %247 : vector<6x1xi32> to vector<6x128xi32>
    %249 = arith.cmpi eq, %26, %248 : vector<6x128xi32>
    %cst_92 = arith.constant 0xFF800000 : f32
    %250 = vector.broadcast %cst_92 : f32 to vector<6x128xf32>
    %251 = arith.select %249, %250, %239 : vector<6x128xi1>, vector<6x128xf32>
    %cst_93 = arith.constant dense<0xFF800000> : vector<6xf32>
    %252 = vector.multi_reduction <maximumf>, %251, %cst_93 [1] : vector<6x128xf32> to vector<6xf32>
    %253 = vector.shape_cast %252 : vector<6xf32> to vector<6x1xf32>
    %254 = vector.broadcast %253 : vector<6x1xf32> to vector<6x128xf32>
    %255 = arith.cmpf oeq, %251, %254 : vector<6x128xf32>
    %c128_i32_94 = arith.constant 128 : i32
    %256 = vector.broadcast %c128_i32_94 : i32 to vector<6x128xi32>
    %257 = arith.select %255, %26, %256 : vector<6x128xi1>, vector<6x128xi32>
    %cst_95 = arith.constant dense<2147483647> : vector<6xi32>
    %258 = vector.multi_reduction <minsi>, %257, %cst_95 [1] : vector<6x128xi32> to vector<6xi32>
    %259 = vector.shape_cast %258 : vector<6xi32> to vector<6x1xi32>
    %260 = vector.broadcast %259 : vector<6x1xi32> to vector<6x128xi32>
    %261 = arith.cmpi eq, %26, %260 : vector<6x128xi32>
    %cst_96 = arith.constant 0xFF800000 : f32
    %262 = vector.broadcast %cst_96 : f32 to vector<6x128xf32>
    %263 = arith.select %261, %262, %251 : vector<6x128xi1>, vector<6x128xf32>
    %cst_97 = arith.constant dense<0xFF800000> : vector<6xf32>
    %264 = vector.multi_reduction <maximumf>, %263, %cst_97 [1] : vector<6x128xf32> to vector<6xf32>
    %265 = vector.shape_cast %264 : vector<6xf32> to vector<6x1xf32>
    %266 = tpu.concatenate %157, %169, %181, %193, %205, %217, %229, %241, %253, %265 in 1 : vector<6x1xf32>, vector<6x1xf32>, vector<6x1xf32>, vector<6x1xf32>, vector<6x1xf32>, vector<6x1xf32>, vector<6x1xf32>, vector<6x1xf32>, vector<6x1xf32>, vector<6x1xf32> -> vector<6x10xf32>
    %267 = vector.broadcast %25 : vector<6x1xf32> to vector<6x10xf32>
    %268 = arith.addf %266, %267 : vector<6x10xf32>
    %269 = math.tanh %268 : vector<6x10xf32>
    %cst_98 = arith.constant 0.000000e+00 : f32
    %270 = vector.broadcast %cst_98 : f32 to vector<6x118xf32>
    %271 = tpu.concatenate %269, %270 in 1 : vector<6x10xf32>, vector<6x118xf32> -> vector<6x128xf32>
    %c1_99 = arith.constant 1 : index
    %c0_100 = arith.constant 0 : index
    %c0_101 = arith.constant 0 : index
    %272 = vector.load %arg4[%c1_99, %c0_100, %c0_101] : memref<2x6x128xf32, #tpu.memory_space<vmem>>, vector<1x6x128xf32>
    %273 = vector.shape_cast %272 : vector<1x6x128xf32> to vector<6x128xf32>
    %274 = vector.shape_cast %271 : vector<6x128xf32> to vector<1x6x128xf32>
    tpu.vector_store %arg4[%c1_99, %c0_100, %c0_101], %274 {strides = array<i32>} : memref<2x6x128xf32, #tpu.memory_space<vmem>>, vector<1x6x128xf32>,
    return
  }
  func.func @transform_0(%arg0: i32) -> (i32, i32, i32) {
    %c0_i32 = arith.constant 0 : i32
    %c0_i32_0 = arith.constant 0 : i32
    %c0_i32_1 = arith.constant 0 : i32
    %c0_i32_2 = arith.constant 0 : i32
    return %c0_i32, %c0_i32_0, %c0_i32_1 : i32, i32, i32
  }
  func.func @transform_1(%arg0: i32) -> (i32, i32) {
    %c0_i32 = arith.constant 0 : i32
    %c0_i32_0 = arith.constant 0 : i32
    %c0_i32_1 = arith.constant 0 : i32
    return %c0_i32, %c0_i32_0 : i32, i32
  }
  func.func @transform_2(%arg0: i32) -> (i32, i32) {
    %c0_i32 = arith.constant 0 : i32
    %c0_i32_0 = arith.constant 0 : i32
    %c0_i32_1 = arith.constant 0 : i32
    return %c0_i32, %c0_i32_0 : i32, i32
  }
  func.func @transform_3(%arg0: i32) -> (i32, i32, i32) {
    %c0_i32 = arith.constant 0 : i32
    %c0_i32_0 = arith.constant 0 : i32
    %c0_i32_1 = arith.constant 0 : i32
    %c0_i32_2 = arith.constant 0 : i32
    return %c0_i32, %c0_i32_0, %c0_i32_1 : i32, i32, i32
  }
}

</mosaic_0001>

<bundles_post_ra>
// kernel: tpu_custom_call.1
= control target key start
LH: loop header
LB: loop body
LE: loop exit
PB: predicated region body
PF: predicated region fallthrough
CT: control target
= control target key end

     0   :  { %8 = vsyncpa [#allocation3], 0  ;;  %s641_s12 = smov [#allocation2]   ;;  %s845_s0 = inlined_call_operand.vmem [shape: f32[2,4,16], index: 0, kind: input, shape index: {}]   ;;  %s846_s1 = inlined_call_operand.hbm [shape: f32[6,12], index: 1, kind: input, shape index: {}]   ;;  %s847_s2 = inlined_call_operand.vmem [shape: f32[6,1], index: 2, kind: input, shape index: {}]   ;;  %s848_s3 = inlined_call_operand.vmem [shape: f32[2,6,128], index: 3, kind: output, shape index: {}]  }
   0x1   :  { %s17_s13 = sshll.u32 %s641_s12, 4  ;;  %s18_s13 = int_to_ptr.vmem [resolvable:$true] %s17_s13 }
   0x2   :  { %s627_s14 = scalar_lea.vmem %s18_s13, 128  ;;  %p632_p1 = scmp.lt.s32.totalorder %s18_s13, %s18_s13 }
   0x3   :  { %p628_p0 = scmp.ne.s32.totalorder %s18_s13, %s627_s14  ;;  %p633_p2 = scmp.lt.s32.totalorder %s627_s14, %s627_s14 }
   0x5   :  { %p634_p3 = por %p633_p2, %p632_p1 }
   0x7   :  { %p635_p4 = pnand %p634_p3, %p628_p0 }
   0x9   :  { %638 = shalt.err (!%p635_p4)
}
   0xa   :  { %20 = dma.hbm_to_vmem [thread:$0]  %s846_s1, 128, %s18_s13, [#allocation3]  }
   0xb   :  { %639 = dma.done.wait [#allocation3], 128  }
   0xc   :  { %640 = vsyncadd [#allocation3], 4294967168  ;;  %v642_v0 = vmov 0.0   ;;  %vm42_vm0 = vcmask 130048   ;;  %vm47_vm1 = vcmask 1043456   ;;  %s643_s21 = smov 1   ;;  %v150_v22 = vlaneseq }
   0xd   :  { %142 = vmatprep.mubr.f32.mxu0 %v642_v0  ;;  %v603_v1 = vld [vmem:[%s845_s0 + $0x4] sm:$0xf]  ;;  %v26_v2 = vld [vmem:[%s845_s0] sm:$0xf]  ;;  %s644_s22 = smov 2   ;;  %vm38_vm2 = vcmask 7168  }
   0xe   :  { %57 = vrot.lane.b32.xlu0 %v603_v1, %s643_s21  ;;  %52 = vrot.lane.b32.xlu1 %v603_v1, %s644_s22  ;;  %v62_v3 = vsel %vm42_vm0, %v603_v1, 0.0  ;;  %v43_v4 = vsel %vm42_vm0, %v26_v2, 0.0  ;;  %vm31_vm3 = vcmask 15360   ;;  %vm40_vm4 = vcmask 138240   ;;  %v67_v20 = vld [vmem:[#allocation2] sm:$0x3f] }
   0xf   :  { %604 = vmatprep.subr.msk.mxu0 %vm47_vm1, %v62_v3  ;;  %vm33_vm5 = vcmask 146432   ;;  %vm68_vm6 = vcmask 97280   ;;  %v683_v23 = vand.u32 127, %v150_v22  ;;  %vm154_vm8 = vcmask 1045504  }
  0x10   :  { %605 = vmatpush1.msk.msra.mxu0 %vm47_vm1, %v43_v4 }
  0x11   :  { %vm152_vm7 = vcmp.lt.s32.totalorder %v683_v23, 18 }
  0x12   :  { %35 = vrot.lane.b32.xlu0 %v26_v2, %s643_s21  ;;  %28 = vrot.lane.b32.xlu1 %v26_v2, %s644_s22 }
  0x80   :  { %v58_v5 = vpop.permute.xlu0 %57  ;;  %v53_v6 = vpop.permute.xlu1 %52 }
  0x81   :  { %v60_v7 = vsel %vm38_vm2, 0.0, %v58_v5  ;;  %v55_v8 = vsel %vm31_vm3, 0.0, %v53_v6 }
  0x82   :  { %v61_v9 = vsel %vm40_vm4, %v60_v7, 0.0  ;;  %v56_v10 = vsel %vm33_vm5, %v55_v8, 0.0 }
  0x83   :  { %v64_v11 = vrot.slane %v61_v9, 4 }
  0x84   :  { %v36_v12 = vpop.permute.xlu0 %35  ;;  %v29_v13 = vpop.permute.xlu1 %28 }
  0x85   :  { %v39_v14 = vsel %vm38_vm2, 0.0, %v36_v12  ;;  %v32_v15 = vsel %vm31_vm3, 0.0, %v29_v13  ;;  %v66_v16 = vsel %vm47_vm1, %v56_v10, %v64_v11 }
  0x86   :  { %v41_v17 = vsel %vm40_vm4, %v39_v14, 0.0  ;;  %v34_v18 = vsel %vm33_vm5, %v32_v15, 0.0  ;;  %108 = vmatprep.subr.mxu0 %v66_v16 }
  0x87   :  { %v45_v19 = vrot.slane %v41_v17, 4 }
  0x89   :  { %v48_v21 = vsel %vm47_vm1, %v34_v18, %v45_v19 }
  0x8a   :  { %109 = vmatpush1.msra.mxu0 %v48_v21 }
  0x8b   :  { %606 = vmatmul.mubr.msk.f32.vlgmr.msra.gmra.mxu0 %vm68_vm6, %v67_v20 }
 0x14b   :  { %v144_v24 = vpop.f32.mrf.mxu0 }
 0x14c   :  { %v153_v25 = vsel %vm152_vm7, %v144_v24, -inf }
 0x14d   :  { %v146_v26 = vpop.f32.mrf.mxu0  ;;  %v155_v27 = vsel %vm154_vm8, %v153_v25, -inf }
 0x14e   :  { %v382_v28 = vsel %vm152_vm7, %v146_v26, -inf  ;;  %156 = vmax.xlane.f32.xlu0 %v155_v27 }
 0x14f   :  { %v383_v29 = vsel %vm154_vm8, %v382_v28, -inf }
 0x150   :  { %384 = vmax.xlane.f32.xlu1 %v383_v29 }
 0x1d7   :  { %v688_v30 = vpop.xlane.xlu0 %156 }
 0x1d8   :  { %vm158_vm9 = vcmp.eq.f32.partialorder %v153_v25, %v688_v30 }
 0x1d9   :  { %v159_v31 = vsel %vm158_vm9, %v683_v23, 128  ;;  %v692_v32 = vpop.xlane.xlu1 %384 }
 0x1da   :  { %vm386_vm10 = vcmp.eq.f32.partialorder %v382_v28, %v692_v32  ;;  %v160_v33 = vsel %vm154_vm8, %v159_v31, 2147483647 }
 0x1db   :  { %v387_v34 = vsel %vm386_vm10, %v683_v23, 128  ;;  %v162_v35 = vshra.s32 %v160_v33, 16  ;;  %v161_v40 = vand.u32 65535, %v160_v33 }
 0x1dc   :  { %v388_v36 = vsel %vm154_vm8, %v387_v34, 2147483647 }
 0x1dd   :  { %v164_v37 = vcvt.s32.f32 %v162_v35  ;;  %v390_v38 = vshra.s32 %v388_v36, 16  ;;  %v163_v42 = vcvt.s32.f32 %v161_v40  ;;  %v389_v43 = vand.u32 65535, %v388_v36 }
 0x1df   :  { %165 = vmin.xlane.f32.xlu0 %v164_v37  ;;  %v392_v39 = vcvt.s32.f32 %v390_v38  ;;  %v391_v46 = vcvt.s32.f32 %v389_v43 }
 0x1e3   :  { %393 = vmin.xlane.f32.xlu0 %v392_v39 }
 0x268   :  { %v166_v41 = vpop.xlane.xlu0 %165 }
 0x269   :  { %vm167_vm11 = vcmp.eq.f32.partialorder %v164_v37, %v166_v41  ;;  %v172_v48 = vcvt.f32.s32 %v166_v41 }
 0x26a   :  { %v168_v44 = vsel %vm167_vm11, %v163_v42, inf }
 0x26b   :  { %169 = vmin.xlane.f32.xlu1 %v168_v44  ;;  %v173_v50 = vshll.u32 %v172_v48, 16 }
 0x26c   :  { %v394_v45 = vpop.xlane.xlu0 %393 }
 0x26d   :  { %vm395_vm12 = vcmp.eq.f32.partialorder %v392_v39, %v394_v45  ;;  %v400_v51 = vcvt.f32.s32 %v394_v45 }
 0x26e   :  { %v396_v47 = vsel %vm395_vm12, %v391_v46, inf }
 0x26f   :  { %397 = vmin.xlane.f32.xlu0 %v396_v47  ;;  %v401_v55 = vshll.u32 %v400_v51, 16 }
 0x2f4   :  { %v170_v49 = vpop.xlane.xlu1 %169 }
 0x2f5   :  { %v171_v52 = vcvt.f32.s32 %v170_v49 }
 0x2f7   :  { %v174_v53 = vadd.s32 %v173_v50, %v171_v52 }
 0x2f8   :  { %v398_v54 = vpop.xlane.xlu0 %397 }
 0x2f9   :  { %v399_v56 = vcvt.f32.s32 %v398_v54  ;;  %vm175_vm13 = vcmp.eq.s32.totalorder %v683_v23, %v174_v53 }
 0x2fa   :  { %v176_v57 = vsel %vm175_vm13, -inf, %v153_v25 }
 0x2fb   :  { %v402_v58 = vadd.s32 %v401_v55, %v399_v56  ;;  %v177_v59 = vsel %vm154_vm8, %v176_v57, -inf }
 0x2fc   :  { %178 = vmax.xlane.f32.xlu1 %v177_v59 }
 0x2fd   :  { %vm403_vm14 = vcmp.eq.s32.totalorder %v683_v23, %v402_v58 }
 0x2fe   :  { %v404_v60 = vsel %vm403_vm14, -inf, %v382_v28 }
 0x2ff   :  { %v405_v61 = vsel %vm154_vm8, %v404_v60, -inf }
 0x300   :  { %406 = vmax.xlane.f32.xlu0 %v405_v61 }
 0x385   :  { %v702_v62 = vpop.xlane.xlu1 %178 }
 0x386   :  { %vm180_vm15 = vcmp.eq.f32.partialorder %v176_v57, %v702_v62 }
 0x387   :  { %v181_v63 = vsel %vm180_vm15, %v683_v23, 128 }
 0x388   :  { %v182_v0 = vsel %vm154_vm8, %v181_v63, 2147483647 }
 0x389   :  { %v707_v1 = vpop.xlane.xlu0 %406  ;;  %v184_v2 = vshra.s32 %v182_v0, 16  ;;  %v183_v8 = vand.u32 65535, %v182_v0 }
 0x38a   :  { %vm408_vm0 = vcmp.eq.f32.partialorder %v404_v60, %v707_v1 }
 0x38b   :  { %v409_v3 = vsel %vm408_vm0, %v683_v23, 128  ;;  %v186_v4 = vcvt.s32.f32 %v184_v2  ;;  %v185_v10 = vcvt.s32.f32 %v183_v8 }
 0x38c   :  { %v410_v5 = vsel %vm154_vm8, %v409_v3, 2147483647 }
 0x38d   :  { %187 = vmin.xlane.f32.xlu1 %v186_v4  ;;  %v412_v6 = vshra.s32 %v410_v5, 16  ;;  %v411_v11 = vand.u32 65535, %v410_v5 }
 0x38f   :  { %v414_v7 = vcvt.s32.f32 %v412_v6  ;;  %v413_v14 = vcvt.s32.f32 %v411_v11 }
 0x391   :  { %415 = vmin.xlane.f32.xlu0 %v414_v7 }
 0x416   :  { %v188_v9 = vpop.xlane.xlu1 %187 }
 0x417   :  { %vm189_vm1 = vcmp.eq.f32.partialorder %v186_v4, %v188_v9  ;;  %v194_v16 = vcvt.f32.s32 %v188_v9 }
 0x418   :  { %v190_v12 = vsel %vm189_vm1, %v185_v10, inf }
 0x419   :  { %191 = vmin.xlane.f32.xlu1 %v190_v12  ;;  %v195_v18 = vshll.u32 %v194_v16, 16 }
 0x41a   :  { %v416_v13 = vpop.xlane.xlu0 %415 }
 0x41b   :  { %vm417_vm4 = vcmp.eq.f32.partialorder %v414_v7, %v416_v13  ;;  %v422_v19 = vcvt.f32.s32 %v416_v13 }
 0x41c   :  { %v418_v15 = vsel %vm417_vm4, %v413_v14, inf }
 0x41d   :  { %419 = vmin.xlane.f32.xlu0 %v418_v15  ;;  %v423_v24 = vshll.u32 %v422_v19, 16 }
 0x4a2   :  { %v192_v17 = vpop.xlane.xlu1 %191 }
 0x4a3   :  { %v193_v20 = vcvt.f32.s32 %v192_v17 }
 0x4a5   :  { %v196_v21 = vadd.s32 %v195_v18, %v193_v20 }
 0x4a6   :  { %v420_v22 = vpop.xlane.xlu0 %419 }
 0x4a7   :  { %v421_v25 = vcvt.f32.s32 %v420_v22  ;;  %vm197_vm5 = vcmp.eq.s32.totalorder %v683_v23, %v196_v21 }
 0x4a8   :  { %v198_v26 = vsel %vm197_vm5, -inf, %v176_v57 }
 0x4a9   :  { %v424_v27 = vadd.s32 %v423_v24, %v421_v25  ;;  %v199_v28 = vsel %vm154_vm8, %v198_v26, -inf }
 0x4aa   :  { %200 = vmax.xlane.f32.xlu1 %v199_v28 }
 0x4ab   :  { %vm425_vm6 = vcmp.eq.s32.totalorder %v683_v23, %v424_v27 }
 0x4ac   :  { %v426_v29 = vsel %vm425_vm6, -inf, %v404_v60 }
 0x4ad   :  { %v427_v31 = vsel %vm154_vm8, %v426_v29, -inf }
 0x4ae   :  { %428 = vmax.xlane.f32.xlu0 %v427_v31 }
 0x533   :  { %v716_v33 = vpop.xlane.xlu1 %200 }
 0x534   :  { %vm202_vm7 = vcmp.eq.f32.partialorder %v198_v26, %v716_v33 }
 0x535   :  { %v203_v34 = vsel %vm202_vm7, %v683_v23, 128 }
 0x536   :  { %v204_v35 = vsel %vm154_vm8, %v203_v34, 2147483647 }
 0x537   :  { %v721_v36 = vpop.xlane.xlu0 %428  ;;  %v206_v37 = vshra.s32 %v204_v35, 16  ;;  %v205_v43 = vand.u32 65535, %v204_v35 }
 0x538   :  { %vm430_vm9 = vcmp.eq.f32.partialorder %v426_v29, %v721_v36 }
 0x539   :  { %v431_v38 = vsel %vm430_vm9, %v683_v23, 128  ;;  %v208_v39 = vcvt.s32.f32 %v206_v37  ;;  %v207_v45 = vcvt.s32.f32 %v205_v43 }
 0x53a   :  { %v432_v40 = vsel %vm154_vm8, %v431_v38, 2147483647 }
 0x53b   :  { %209 = vmin.xlane.f32.xlu1 %v208_v39  ;;  %v434_v41 = vshra.s32 %v432_v40, 16  ;;  %v433_v46 = vand.u32 65535, %v432_v40 }
 0x53d   :  { %v436_v42 = vcvt.s32.f32 %v434_v41  ;;  %v435_v49 = vcvt.s32.f32 %v433_v46 }
 0x53f   :  { %437 = vmin.xlane.f32.xlu0 %v436_v42 }
 0x5c4   :  { %v210_v44 = vpop.xlane.xlu1 %209 }
 0x5c5   :  { %vm211_vm10 = vcmp.eq.f32.partialorder %v208_v39, %v210_v44  ;;  %v216_v51 = vcvt.f32.s32 %v210_v44 }
 0x5c6   :  { %v212_v47 = vsel %vm211_vm10, %v207_v45, inf }
 0x5c7   :  { %213 = vmin.xlane.f32.xlu1 %v212_v47  ;;  %v217_v53 = vshll.u32 %v216_v51, 16 }
 0x5c8   :  { %v438_v48 = vpop.xlane.xlu0 %437 }
 0x5c9   :  { %vm439_vm11 = vcmp.eq.f32.partialorder %v436_v42, %v438_v48  ;;  %v444_v54 = vcvt.f32.s32 %v438_v48 }
 0x5ca   :  { %v440_v50 = vsel %vm439_vm11, %v435_v49, inf }
 0x5cb   :  { %441 = vmin.xlane.f32.xlu0 %v440_v50  ;;  %v445_v58 = vshll.u32 %v444_v54, 16 }
 0x650   :  { %v214_v52 = vpop.xlane.xlu1 %213 }
 0x651   :  { %v215_v55 = vcvt.f32.s32 %v214_v52 }
 0x653   :  { %v218_v56 = vadd.s32 %v217_v53, %v215_v55 }
 0x654   :  { %v442_v57 = vpop.xlane.xlu0 %441 }
 0x655   :  { %v443_v59 = vcvt.f32.s32 %v442_v57  ;;  %vm219_vm12 = vcmp.eq.s32.totalorder %v683_v23, %v218_v56 }
 0x656   :  { %v220_v60 = vsel %vm219_vm12, -inf, %v198_v26 }
 0x657   :  { %v446_v61 = vadd.s32 %v445_v58, %v443_v59  ;;  %v221_v63 = vsel %vm154_vm8, %v220_v60, -inf }
 0x658   :  { %222 = vmax.xlane.f32.xlu1 %v221_v63 }
 0x659   :  { %vm447_vm13 = vcmp.eq.s32.totalorder %v683_v23, %v446_v61 }
 0x65a   :  { %v448_v0 = vsel %vm447_vm13, -inf, %v426_v29 }
 0x65b   :  { %v449_v2 = vsel %vm154_vm8, %v448_v0, -inf }
 0x65c   :  { %450 = vmax.xlane.f32.xlu0 %v449_v2 }
 0x6e1   :  { %v730_v3 = vpop.xlane.xlu1 %222 }
 0x6e2   :  { %vm224_vm14 = vcmp.eq.f32.partialorder %v220_v60, %v730_v3 }
 0x6e3   :  { %v225_v4 = vsel %vm224_vm14, %v683_v23, 128 }
 0x6e4   :  { %v226_v5 = vsel %vm154_vm8, %v225_v4, 2147483647 }
 0x6e5   :  { %v735_v6 = vpop.xlane.xlu0 %450  ;;  %v228_v7 = vshra.s32 %v226_v5, 16  ;;  %v227_v13 = vand.u32 65535, %v226_v5 }
 0x6e6   :  { %vm452_vm15 = vcmp.eq.f32.partialorder %v448_v0, %v735_v6 }
 0x6e7   :  { %v453_v8 = vsel %vm452_vm15, %v683_v23, 128  ;;  %v230_v9 = vcvt.s32.f32 %v228_v7  ;;  %v229_v15 = vcvt.s32.f32 %v227_v13 }
 0x6e8   :  { %v454_v10 = vsel %vm154_vm8, %v453_v8, 2147483647 }
 0x6e9   :  { %231 = vmin.xlane.f32.xlu1 %v230_v9  ;;  %v456_v11 = vshra.s32 %v454_v10, 16  ;;  %v455_v16 = vand.u32 65535, %v454_v10 }
 0x6eb   :  { %v458_v12 = vcvt.s32.f32 %v456_v11  ;;  %v457_v19 = vcvt.s32.f32 %v455_v16 }
 0x6ed   :  { %459 = vmin.xlane.f32.xlu0 %v458_v12 }
 0x772   :  { %v232_v14 = vpop.xlane.xlu1 %231 }
 0x773   :  { %vm233_vm0 = vcmp.eq.f32.partialorder %v230_v9, %v232_v14  ;;  %v238_v21 = vcvt.f32.s32 %v232_v14 }
 0x774   :  { %v234_v17 = vsel %vm233_vm0, %v229_v15, inf }
 0x775   :  { %235 = vmin.xlane.f32.xlu1 %v234_v17  ;;  %v239_v24 = vshll.u32 %v238_v21, 16 }
 0x776   :  { %v460_v18 = vpop.xlane.xlu0 %459 }
 0x777   :  { %vm461_vm1 = vcmp.eq.f32.partialorder %v458_v12, %v460_v18  ;;  %v466_v25 = vcvt.f32.s32 %v460_v18 }
 0x778   :  { %v462_v20 = vsel %vm461_vm1, %v457_v19, inf }
 0x779   :  { %463 = vmin.xlane.f32.xlu0 %v462_v20  ;;  %v467_v29 = vshll.u32 %v466_v25, 16 }
 0x7fe   :  { %v236_v22 = vpop.xlane.xlu1 %235 }
 0x7ff   :  { %v237_v26 = vcvt.f32.s32 %v236_v22 }
 0x801   :  { %v240_v27 = vadd.s32 %v239_v24, %v237_v26 }
 0x802   :  { %v464_v28 = vpop.xlane.xlu0 %463 }
 0x803   :  { %v465_v31 = vcvt.f32.s32 %v464_v28  ;;  %vm241_vm4 = vcmp.eq.s32.totalorder %v683_v23, %v240_v27 }
 0x804   :  { %v242_v34 = vsel %vm241_vm4, -inf, %v220_v60 }
 0x805   :  { %v468_v35 = vadd.s32 %v467_v29, %v465_v31  ;;  %v243_v37 = vsel %vm154_vm8, %v242_v34, -inf }
 0x806   :  { %244 = vmax.xlane.f32.xlu1 %v243_v37 }
 0x807   :  { %vm469_vm5 = vcmp.eq.s32.totalorder %v683_v23, %v468_v35 }
 0x808   :  { %v470_v38 = vsel %vm469_vm5, -inf, %v448_v0 }
 0x809   :  { %v471_v39 = vsel %vm154_vm8, %v470_v38, -inf }
 0x80a   :  { %472 = vmax.xlane.f32.xlu0 %v471_v39 }
 0x88f   :  { %v744_v40 = vpop.xlane.xlu1 %244 }
 0x890   :  { %vm246_vm6 = vcmp.eq.f32.partialorder %v242_v34, %v744_v40 }
 0x891   :  { %v247_v41 = vsel %vm246_vm6, %v683_v23, 128 }
 0x892   :  { %v248_v42 = vsel %vm154_vm8, %v247_v41, 2147483647 }
 0x893   :  { %v749_v43 = vpop.xlane.xlu0 %472  ;;  %v250_v44 = vshra.s32 %v248_v42, 16  ;;  %v249_v50 = vand.u32 65535, %v248_v42 }
 0x894   :  { %vm474_vm7 = vcmp.eq.f32.partialorder %v470_v38, %v749_v43 }
 0x895   :  { %v475_v45 = vsel %vm474_vm7, %v683_v23, 128  ;;  %v252_v46 = vcvt.s32.f32 %v250_v44  ;;  %v251_v52 = vcvt.s32.f32 %v249_v50 }
 0x896   :  { %v476_v47 = vsel %vm154_vm8, %v475_v45, 2147483647 }
 0x897   :  { %253 = vmin.xlane.f32.xlu1 %v252_v46  ;;  %v478_v48 = vshra.s32 %v476_v47, 16  ;;  %v477_v53 = vand.u32 65535, %v476_v47 }
 0x899   :  { %v480_v49 = vcvt.s32.f32 %v478_v48  ;;  %v479_v56 = vcvt.s32.f32 %v477_v53 }
 0x89b   :  { %481 = vmin.xlane.f32.xlu0 %v480_v49 }
 0x920   :  { %v254_v51 = vpop.xlane.xlu1 %253 }
 0x921   :  { %vm255_vm9 = vcmp.eq.f32.partialorder %v252_v46, %v254_v51  ;;  %v260_v58 = vcvt.f32.s32 %v254_v51 }
 0x922   :  { %v256_v54 = vsel %vm255_vm9, %v251_v52, inf }
 0x923   :  { %257 = vmin.xlane.f32.xlu1 %v256_v54  ;;  %v261_v60 = vshll.u32 %v260_v58, 16 }
 0x924   :  { %v482_v55 = vpop.xlane.xlu0 %481 }
 0x925   :  { %vm483_vm10 = vcmp.eq.f32.partialorder %v480_v49, %v482_v55  ;;  %v488_v61 = vcvt.f32.s32 %v482_v55 }
 0x926   :  { %v484_v57 = vsel %vm483_vm10, %v479_v56, inf }
 0x927   :  { %485 = vmin.xlane.f32.xlu0 %v484_v57  ;;  %v489_v4 = vshll.u32 %v488_v61, 16 }
 0x9ac   :  { %v258_v59 = vpop.xlane.xlu1 %257 }
 0x9ad   :  { %v259_v63 = vcvt.f32.s32 %v258_v59 }
 0x9af   :  { %v262_v0 = vadd.s32 %v261_v60, %v259_v63 }
 0x9b0   :  { %v486_v2 = vpop.xlane.xlu0 %485 }
 0x9b1   :  { %v487_v5 = vcvt.f32.s32 %v486_v2  ;;  %vm263_vm11 = vcmp.eq.s32.totalorder %v683_v23, %v262_v0 }
 0x9b2   :  { %v264_v7 = vsel %vm263_vm11, -inf, %v242_v34 }
 0x9b3   :  { %v490_v8 = vadd.s32 %v489_v4, %v487_v5  ;;  %v265_v9 = vsel %vm154_vm8, %v264_v7, -inf }
 0x9b4   :  { %266 = vmax.xlane.f32.xlu1 %v265_v9 }
 0x9b5   :  { %vm491_vm12 = vcmp.eq.s32.totalorder %v683_v23, %v490_v8 }
 0x9b6   :  { %v492_v10 = vsel %vm491_vm12, -inf, %v470_v38 }
 0x9b7   :  { %v493_v11 = vsel %vm154_vm8, %v492_v10, -inf }
 0x9b8   :  { %494 = vmax.xlane.f32.xlu0 %v493_v11 }
 0xa3d   :  { %v758_v12 = vpop.xlane.xlu1 %266 }
 0xa3e   :  { %vm268_vm13 = vcmp.eq.f32.partialorder %v264_v7, %v758_v12 }
 0xa3f   :  { %v269_v13 = vsel %vm268_vm13, %v683_v23, 128 }
 0xa40   :  { %v270_v14 = vsel %vm154_vm8, %v269_v13, 2147483647 }
 0xa41   :  { %v763_v15 = vpop.xlane.xlu0 %494  ;;  %v272_v16 = vshra.s32 %v270_v14, 16  ;;  %v271_v22 = vand.u32 65535, %v270_v14 }
 0xa42   :  { %vm496_vm14 = vcmp.eq.f32.partialorder %v492_v10, %v763_v15 }
 0xa43   :  { %v497_v17 = vsel %vm496_vm14, %v683_v23, 128  ;;  %v274_v18 = vcvt.s32.f32 %v272_v16  ;;  %v273_v25 = vcvt.s32.f32 %v271_v22 }
 0xa44   :  { %v498_v19 = vsel %vm154_vm8, %v497_v17, 2147483647 }
 0xa45   :  { %275 = vmin.xlane.f32.xlu1 %v274_v18  ;;  %v500_v20 = vshra.s32 %v498_v19, 16  ;;  %v499_v26 = vand.u32 65535, %v498_v19 }
 0xa47   :  { %v502_v21 = vcvt.s32.f32 %v500_v20  ;;  %v501_v29 = vcvt.s32.f32 %v499_v26 }
 0xa49   :  { %503 = vmin.xlane.f32.xlu0 %v502_v21 }
 0xace   :  { %v276_v24 = vpop.xlane.xlu1 %275 }
 0xacf   :  { %vm277_vm15 = vcmp.eq.f32.partialorder %v274_v18, %v276_v24  ;;  %v282_v34 = vcvt.f32.s32 %v276_v24 }
 0xad0   :  { %v278_v27 = vsel %vm277_vm15, %v273_v25, inf }
 0xad1   :  { %279 = vmin.xlane.f32.xlu1 %v278_v27  ;;  %v283_v37 = vshll.u32 %v282_v34, 16 }
 0xad2   :  { %v504_v28 = vpop.xlane.xlu0 %503 }
 0xad3   :  { %vm505_vm0 = vcmp.eq.f32.partialorder %v502_v21, %v504_v28  ;;  %v510_v38 = vcvt.f32.s32 %v504_v28 }
 0xad4   :  { %v506_v31 = vsel %vm505_vm0, %v501_v29, inf }
 0xad5   :  { %507 = vmin.xlane.f32.xlu0 %v506_v31  ;;  %v511_v44 = vshll.u32 %v510_v38, 16 }
 0xb5a   :  { %v280_v35 = vpop.xlane.xlu1 %279 }
 0xb5b   :  { %v281_v39 = vcvt.f32.s32 %v280_v35 }
 0xb5d   :  { %v284_v41 = vadd.s32 %v283_v37, %v281_v39 }
 0xb5e   :  { %v508_v42 = vpop.xlane.xlu0 %507 }
 0xb5f   :  { %v509_v45 = vcvt.f32.s32 %v508_v42  ;;  %vm285_vm1 = vcmp.eq.s32.totalorder %v683_v23, %v284_v41 }
 0xb60   :  { %v286_v46 = vsel %vm285_vm1, -inf, %v264_v7 }
 0xb61   :  { %v512_v47 = vadd.s32 %v511_v44, %v509_v45  ;;  %v287_v48 = vsel %vm154_vm8, %v286_v46, -inf }
 0xb62   :  { %288 = vmax.xlane.f32.xlu1 %v287_v48 }
 0xb63   :  { %vm513_vm4 = vcmp.eq.s32.totalorder %v683_v23, %v512_v47 }
 0xb64   :  { %v514_v49 = vsel %vm513_vm4, -inf, %v492_v10 }
 0xb65   :  { %v515_v50 = vsel %vm154_vm8, %v514_v49, -inf }
 0xb66   :  { %516 = vmax.xlane.f32.xlu0 %v515_v50 }
 0xbeb   :  { %v772_v51 = vpop.xlane.xlu1 %288 }
 0xbec   :  { %vm290_vm5 = vcmp.eq.f32.partialorder %v286_v46, %v772_v51 }
 0xbed   :  { %v291_v52 = vsel %vm290_vm5, %v683_v23, 128 }
 0xbee   :  { %v292_v53 = vsel %vm154_vm8, %v291_v52, 2147483647 }
 0xbef   :  { %v777_v54 = vpop.xlane.xlu0 %516  ;;  %v294_v55 = vshra.s32 %v292_v53, 16  ;;  %v293_v61 = vand.u32 65535, %v292_v53 }
 0xbf0   :  { %vm518_vm6 = vcmp.eq.f32.partialorder %v514_v49, %v777_v54 }
 0xbf1   :  { %v519_v56 = vsel %vm518_vm6, %v683_v23, 128  ;;  %v296_v57 = vcvt.s32.f32 %v294_v55  ;;  %v295_v0 = vcvt.s32.f32 %v293_v61 }
 0xbf2   :  { %v520_v58 = vsel %vm154_vm8, %v519_v56, 2147483647 }
 0xbf3   :  { %297 = vmin.xlane.f32.xlu1 %v296_v57  ;;  %v522_v59 = vshra.s32 %v520_v58, 16  ;;  %v521_v2 = vand.u32 65535, %v520_v58 }
 0xbf5   :  { %v524_v60 = vcvt.s32.f32 %v522_v59  ;;  %v523_v7 = vcvt.s32.f32 %v521_v2 }
 0xbf7   :  { %525 = vmin.xlane.f32.xlu0 %v524_v60 }
 0xc7c   :  { %v298_v63 = vpop.xlane.xlu1 %297 }
 0xc7d   :  { %vm299_vm7 = vcmp.eq.f32.partialorder %v296_v57, %v298_v63  ;;  %v304_v9 = vcvt.f32.s32 %v298_v63 }
 0xc7e   :  { %v300_v4 = vsel %vm299_vm7, %v295_v0, inf }
 0xc7f   :  { %301 = vmin.xlane.f32.xlu1 %v300_v4  ;;  %v305_v11 = vshll.u32 %v304_v9, 16 }
 0xc80   :  { %v526_v5 = vpop.xlane.xlu0 %525 }
 0xc81   :  { %vm527_vm9 = vcmp.eq.f32.partialorder %v524_v60, %v526_v5  ;;  %v532_v13 = vcvt.f32.s32 %v526_v5 }
 0xc82   :  { %v528_v8 = vsel %vm527_vm9, %v523_v7, inf }
 0xc83   :  { %529 = vmin.xlane.f32.xlu0 %v528_v8  ;;  %v533_v18 = vshll.u32 %v532_v13, 16 }
 0xd08   :  { %v302_v10 = vpop.xlane.xlu1 %301 }
 0xd09   :  { %v303_v14 = vcvt.f32.s32 %v302_v10 }
 0xd0b   :  { %v306_v16 = vadd.s32 %v305_v11, %v303_v14 }
 0xd0c   :  { %v530_v17 = vpop.xlane.xlu0 %529 }
 0xd0d   :  { %v531_v19 = vcvt.f32.s32 %v530_v17  ;;  %vm307_vm10 = vcmp.eq.s32.totalorder %v683_v23, %v306_v16 }
 0xd0e   :  { %v308_v20 = vsel %vm307_vm10, -inf, %v286_v46 }
 0xd0f   :  { %v534_v21 = vadd.s32 %v533_v18, %v531_v19  ;;  %v309_v22 = vsel %vm154_vm8, %v308_v20, -inf }
 0xd10   :  { %310 = vmax.xlane.f32.xlu1 %v309_v22 }
 0xd11   :  { %vm535_vm11 = vcmp.eq.s32.totalorder %v683_v23, %v534_v21 }
 0xd12   :  { %v536_v24 = vsel %vm535_vm11, -inf, %v514_v49  ;;  %vm358_vm11 = vcmask 23552  }
 0xd13   :  { %v537_v25 = vsel %vm154_vm8, %v536_v24, -inf }
 0xd14   :  { %538 = vmax.xlane.f32.xlu0 %v537_v25 }
 0xd99   :  { %v786_v26 = vpop.xlane.xlu1 %310 }
 0xd9a   :  { %vm312_vm12 = vcmp.eq.f32.partialorder %v308_v20, %v786_v26 }
 0xd9b   :  { %v313_v27 = vsel %vm312_vm12, %v683_v23, 128  ;;  %vm360_vm12 = vcmask 31744  }
 0xd9c   :  { %v314_v28 = vsel %vm154_vm8, %v313_v27, 2147483647 }
 0xd9d   :  { %v791_v29 = vpop.xlane.xlu0 %538  ;;  %v316_v31 = vshra.s32 %v314_v28, 16  ;;  %v315_v41 = vand.u32 65535, %v314_v28  ;;  %v645_v28 = vmov 0  }
 0xd9e   :  { %vm540_vm13 = vcmp.eq.f32.partialorder %v536_v24, %v791_v29  ;;  %613 = vset.pattern.permute.xlu1 %v645_v28  ;;  %614 = vset.pattern.permute.xlu0 %v645_v28 }
 0xd9f   :  { %v541_v34 = vsel %vm540_vm13, %v683_v23, 128  ;;  %v318_v35 = vcvt.s32.f32 %v316_v31  ;;  %v317_v44 = vcvt.s32.f32 %v315_v41  ;;  %vm364_vm13 = vcmask 48128  }
 0xda0   :  { %v542_v37 = vsel %vm154_vm8, %v541_v34, 2147483647 }
 0xda1   :  { %319 = vmin.xlane.f32.xlu1 %v318_v35  ;;  %v544_v38 = vshra.s32 %v542_v37, 16  ;;  %v543_v45 = vand.u32 65535, %v542_v37 }
 0xda3   :  { %v546_v39 = vcvt.s32.f32 %v544_v38  ;;  %v545_v48 = vcvt.s32.f32 %v543_v45 }
 0xda5   :  { %547 = vmin.xlane.f32.xlu0 %v546_v39 }
 0xe2a   :  { %v320_v42 = vpop.xlane.xlu1 %319 }
 0xe2b   :  { %vm321_vm14 = vcmp.eq.f32.partialorder %v318_v35, %v320_v42  ;;  %v326_v50 = vcvt.f32.s32 %v320_v42 }
 0xe2c   :  { %v322_v46 = vsel %vm321_vm14, %v317_v44, inf  ;;  %vm366_vm14 = vcmask 56320  }
 0xe2d   :  { %323 = vmin.xlane.f32.xlu1 %v322_v46  ;;  %v327_v53 = vshll.u32 %v326_v50, 16  ;;  %v149_v50 = vld [vmem:[%s847_s2] sm:$0x3f] }
 0xe2e   :  { %v548_v47 = vpop.xlane.xlu0 %547 }
 0xe2f   :  { %vm549_vm15 = vcmp.eq.f32.partialorder %v546_v39, %v548_v47  ;;  %v554_v55 = vcvt.f32.s32 %v548_v47 }
 0xe30   :  { %v550_v49 = vsel %vm549_vm15, %v545_v48, inf  ;;  %vm370_vm15 = vcmask 72704  }
 0xe31   :  { %551 = vmin.xlane.f32.xlu0 %v550_v49  ;;  %v555_v59 = vshll.u32 %v554_v55, 16 }
 0xeb6   :  { %v324_v52 = vpop.xlane.xlu1 %323 }
 0xeb7   :  { %v325_v56 = vcvt.f32.s32 %v324_v52  ;;  %v356_v52 = vsel %vm38_vm2, %v688_v30, %v702_v62 }
 0xeb9   :  { %v328_v57 = vadd.s32 %v327_v53, %v325_v56  ;;  %v584_v53 = vsel %vm38_vm2, %v692_v32, %v707_v1  ;;  %vm368_vm2 = vcmask 64512  }
 0xeba   :  { %v552_v58 = vpop.xlane.xlu0 %551  ;;  %v585_v55 = vsel %vm31_vm3, %v584_v53, %v721_v36 }
 0xebb   :  { %v553_v60 = vcvt.f32.s32 %v552_v58  ;;  %vm329_vm0 = vcmp.eq.s32.totalorder %v683_v23, %v328_v57  ;;  %v586_v57 = vsel %vm358_vm11, %v585_v55, %v735_v6 }
 0xebc   :  { %v330_v61 = vsel %vm329_vm0, -inf, %v308_v20  ;;  %v587_v30 = vsel %vm360_vm12, %v586_v57, %v749_v43 }
 0xebd   :  { %v556_v63 = vadd.s32 %v555_v59, %v553_v60  ;;  %v331_v0 = vsel %vm154_vm8, %v330_v61, -inf }
 0xebe   :  { %332 = vmax.xlane.f32.xlu1 %v331_v0 }
 0xebf   :  { %vm557_vm1 = vcmp.eq.s32.totalorder %v683_v23, %v556_v63 }
 0xec0   :  { %v558_v2 = vsel %vm557_vm1, -inf, %v536_v24 }
 0xec1   :  { %v559_v4 = vsel %vm154_vm8, %v558_v2, -inf }
 0xec2   :  { %560 = vmax.xlane.f32.xlu0 %v559_v4 }
 0xf47   :  { %v800_v5 = vpop.xlane.xlu1 %332 }
 0xf48   :  { %vm334_vm4 = vcmp.eq.f32.partialorder %v330_v61, %v800_v5 }
 0xf49   :  { %v335_v7 = vsel %vm334_vm4, %v683_v23, 128 }
 0xf4a   :  { %v336_v8 = vsel %vm154_vm8, %v335_v7, 2147483647 }
 0xf4b   :  { %v805_v9 = vpop.xlane.xlu0 %560  ;;  %v338_v10 = vshra.s32 %v336_v8, 16  ;;  %v337_v18 = vand.u32 65535, %v336_v8 }
 0xf4c   :  { %vm562_vm5 = vcmp.eq.f32.partialorder %v558_v2, %v805_v9 }
 0xf4d   :  { %v563_v11 = vsel %vm562_vm5, %v683_v23, 128  ;;  %v340_v13 = vcvt.s32.f32 %v338_v10  ;;  %v339_v20 = vcvt.s32.f32 %v337_v18 }
 0xf4e   :  { %v564_v14 = vsel %vm154_vm8, %v563_v11, 2147483647 }
 0xf4f   :  { %341 = vmin.xlane.f32.xlu1 %v340_v13  ;;  %v566_v16 = vshra.s32 %v564_v14, 16  ;;  %v565_v21 = vand.u32 65535, %v564_v14 }
 0xf51   :  { %v568_v17 = vcvt.s32.f32 %v566_v16  ;;  %v567_v25 = vcvt.s32.f32 %v565_v21 }
 0xf53   :  { %569 = vmin.xlane.f32.xlu0 %v568_v17 }
 0xfd8   :  { %v342_v19 = vpop.xlane.xlu1 %341 }
 0xfd9   :  { %vm343_vm6 = vcmp.eq.f32.partialorder %v340_v13, %v342_v19  ;;  %v348_v31 = vcvt.f32.s32 %v342_v19 }
 0xfda   :  { %v344_v22 = vsel %vm343_vm6, %v339_v20, inf }
 0xfdb   :  { %345 = vmin.xlane.f32.xlu1 %v344_v22  ;;  %v349_v35 = vshll.u32 %v348_v31, 16 }
 0xfdc   :  { %v570_v24 = vpop.xlane.xlu0 %569 }
 0xfdd   :  { %vm571_vm7 = vcmp.eq.f32.partialorder %v568_v17, %v570_v24  ;;  %v576_v37 = vcvt.f32.s32 %v570_v24 }
 0xfde   :  { %v572_v27 = vsel %vm571_vm7, %v567_v25, inf }
 0xfdf   :  { %573 = vmin.xlane.f32.xlu0 %v572_v27  ;;  %v577_v42 = vshll.u32 %v576_v37, 16 }
0x1064   :  { %v346_v34 = vpop.xlane.xlu1 %345 }
0x1065   :  { %v347_v38 = vcvt.f32.s32 %v346_v34 }
0x1067   :  { %v350_v39 = vadd.s32 %v349_v35, %v347_v38 }
0x1068   :  { %v574_v41 = vpop.xlane.xlu0 %573 }
0x1069   :  { %v575_v44 = vcvt.f32.s32 %v574_v41  ;;  %vm351_vm9 = vcmp.eq.s32.totalorder %v683_v23, %v350_v39 }
0x106a   :  { %v352_v45 = vsel %vm351_vm9, -inf, %v330_v61 }
0x106b   :  { %v578_v46 = vadd.s32 %v577_v42, %v575_v44  ;;  %v353_v47 = vsel %vm154_vm8, %v352_v45, -inf }
0x106c   :  { %354 = vmax.xlane.f32.xlu1 %v353_v47 }
0x106d   :  { %vm579_vm10 = vcmp.eq.s32.totalorder %v683_v23, %v578_v46  ;;  %v357_v23 = vsel %vm31_vm3, %v356_v52, %v716_v33  ;;  %vm379_vm3 = vcmask 80896  }
0x106e   :  { %v580_v48 = vsel %vm579_vm10, -inf, %v558_v2  ;;  %v359_v56 = vsel %vm358_vm11, %v357_v23, %v730_v3 }
0x106f   :  { %v581_v49 = vsel %vm154_vm8, %v580_v48, -inf  ;;  %vm362_vm8 = vcmask 39936   ;;  %v361_v58 = vsel %vm360_vm12, %v359_v56, %v744_v40 }
0x1070   :  { %582 = vmax.xlane.f32.xlu0 %v581_v49  ;;  %v363_v62 = vsel %vm362_vm8, %v361_v58, %v758_v12  ;;  %v588_v1 = vsel %vm362_vm8, %v587_v30, %v763_v15 }
0x1071   :  { %v365_v33 = vsel %vm364_vm13, %v363_v62, %v772_v51  ;;  %v589_v36 = vsel %vm364_vm13, %v588_v1, %v777_v54 }
0x1072   :  { %v367_v3 = vsel %vm366_vm14, %v365_v33, %v786_v26  ;;  %v590_v6 = vsel %vm366_vm14, %v589_v36, %v791_v29 }
0x1073   :  { %v369_v40 = vsel %vm368_vm2, %v367_v3, %v800_v5  ;;  %v591_v59 = vsel %vm368_vm2, %v590_v6, %v805_v9 }
0x107d   :  { %374 = vperm.xlu1 %613, %v149_v50  }
0x10f5   :  { %v355_v32 = vpop.xlane.xlu1 %354 }
0x10f6   :  { %v371_v60 = vsel %vm370_vm15, %v369_v40, %v355_v32 }
0x10f9   :  { %v583_v43 = vpop.xlane.xlu0 %582  ;;  %v375_v12 = vpop.permute.xlu1 %374 }
0x10fa   :  { %v592_v61 = vsel %vm370_vm15, %v591_v59, %v583_v43  ;;  %v377_v63 = vadd.f32 %v375_v12, %v371_v60 }
0x10fb   :  { %v593_v0 = vadd.f32 %v592_v61, %v375_v12 }
0x10fc   :  { %615 = vtanh.f32 %v377_v63 }
0x10fd   :  { %617 = vtanh.f32 %v593_v0 }
0x1109   :  { %v616_v15 = vpop.eup %615 }
0x110a   :  { %v618_v51 = vpop.eup %617  ;;  %v380_v54 = vsel %vm379_vm3, %v616_v15, 0.0 }
0x110b   :  { %381 = vst [vmem:[%s848_s3] sm:$0x3f] %v380_v54  ;;  %v595_v26 = vsel %vm379_vm3, %v618_v51, 0.0 }
0x110c   :  { %607 = vst [vmem:[%s848_s3 + $0x8] sm:$0x3f] %v595_v26 }
0x110d   :  { %602 = vsyncpa [#allocation3], 1 }

</bundles_post_ra>
